<compile_context>
chip_gen: v7x
topology: tpu7x:2x2x1
jax: 0.10.0
libtpu: 0.0.40
codegen_flags: <defaults>
</compile_context>

<pallas_src>
import jax
import jax.numpy as jnp
from jax.experimental import pallas as pl
from jax.experimental.pallas import tpu as pltpu


SUBLANE = 8
LANE = 128
VREG_ELEMS = SUBLANE * LANE          # 1024 elements per (8, 128) vreg tile
MAX_TILES_PER_STEP = 1024            # 4 MiB f32 per input per grid step
INNER_TILES = 32                     # vreg tiles per in-kernel fori_loop iteration
VMEM_LIMIT_BYTES = 32 * 1024 * 1024  # > v5e's 16 MiB scoped default, < every chip's physical VMEM
DEFAULT_MIN_KERNEL_ELEMS = 128 * 1024  # below this, launch/fixed overhead dominates -> pure JAX


def _dice_sums_kernel(x_ref, t_ref, inter_ref, total_ref):
    """Accumulate vreg-shaped partial sums of x*t and (x + t).

    x_ref / t_ref : (k, 8, 128) input blocks in their original dtype.
    inter_ref / total_ref : (8, 128) f32 accumulators, resident across the
    single "arbitrary" grid axis (same output block every step).
    """
    step = pl.program_id(0)

    @pl.when(step == 0)
    def _init():
        inter_ref[...] = jnp.zeros_like(inter_ref)
        total_ref[...] = jnp.zeros_like(total_ref)

    k = x_ref.shape[0]                      # static
    n_inner = k // INNER_TILES
    tail = k - n_inner * INNER_TILES

    def accum(xs, ts, carry):
        inter_acc, total_acc = carry
        xs = xs.astype(jnp.float32)
        ts = ts.astype(jnp.float32)
        # Reduce only over the leading vreg-count axis: pure VPU adds, no
        # cross-lane (XLU) work in the hot loop.
        inter_acc = inter_acc + jnp.sum(xs * ts, axis=0)
        total_acc = total_acc + jnp.sum(xs + ts, axis=0)
        return inter_acc, total_acc

    def body(j, carry):
        off = pl.multiple_of(j * INNER_TILES, INNER_TILES)
        return accum(x_ref[pl.ds(off, INNER_TILES)],
                     t_ref[pl.ds(off, INNER_TILES)],
                     carry)

    zeros = jnp.zeros((SUBLANE, LANE), jnp.float32)
    carry = (zeros, zeros)
    if n_inner > 0:                         # static Python branch
        carry = jax.lax.fori_loop(0, n_inner, body, carry)
    if tail > 0:                            # static Python branch
        off = n_inner * INNER_TILES
        carry = accum(x_ref[pl.ds(off, tail)], t_ref[pl.ds(off, tail)], carry)

    inter_ref[...] += carry[0]
    total_ref[...] += carry[1]


def _dice_from_sums(intersection, total, smooth):
    dice = (2.0 * intersection + smooth) / (total + smooth)
    return 1.0 - dice


def dice_loss(inputs, targets, smooth=1.0, *,
              min_kernel_elems=DEFAULT_MIN_KERNEL_ELEMS):
    """Pallas DiceLoss.forward: 1 - (2*sum(x*t) + s) / (sum(x) + sum(t) + s)."""
    x = inputs.reshape(-1)
    t = targets.reshape(-1)
    n = x.shape[0]

    chunks = n // VREG_ELEMS                # whole (8, 128) tiles

    # Tiny inputs: fixed pallas_call overhead dominates -> plain JAX.
    if chunks == 0 or n < min_kernel_elems:
        xf = x.astype(jnp.float32)
        tf = t.astype(jnp.float32)
        return _dice_from_sums(jnp.sum(xf * tf), jnp.sum(xf) + jnp.sum(tf), smooth)

    # Bounded-waste tiling: `blocks` grid steps of `k` tiles each covering
    # blocks*k <= chunks tiles; the (< blocks) leftover tiles plus any
    # sub-tile remainder go to the tiny JAX epilogue below.
    blocks = pl.cdiv(chunks, MAX_TILES_PER_STEP)
    k = chunks // blocks                    # tiles per grid step (<= MAX_TILES_PER_STEP)
    cov_tiles = blocks * k
    n_cov = cov_tiles * VREG_ELEMS

    if n % VREG_ELEMS == 0:
        # Free bitcast of the full flat array: no pad, no copy.  The grid
        # simply reads the first cov_tiles tiles.
        xk = x.reshape(chunks, SUBLANE, LANE)
        tk = t.reshape(chunks, SUBLANE, LANE)
    else:
        # Unaligned callers: reshape only the covered prefix (one extra copy of
        # that prefix).  A fully copy-free unaligned path would stream the flat
        # arrays with memory_space=pl.ANY + manual DMA; not needed when call
        # sites keep n a multiple of 1024 (as in typical (B,C,H,W) inputs).
        xk = x[:n_cov].reshape(cov_tiles, SUBLANE, LANE)
        tk = t[:n_cov].reshape(cov_tiles, SUBLANE, LANE)

    in_spec = pl.BlockSpec((k, SUBLANE, LANE), lambda i: (i, 0, 0))
    out_spec = pl.BlockSpec((SUBLANE, LANE), lambda i: (0, 0))
    part_shape = jax.ShapeDtypeStruct((SUBLANE, LANE), jnp.float32)

    itemsize = x.dtype.itemsize + t.dtype.itemsize
    cost = pl.CostEstimate(
        flops=3 * n_cov,
        transcendentals=0,
        bytes_accessed=n_cov * itemsize + 2 * VREG_ELEMS * 4,
    )

    inter_tile, total_tile = pl.pallas_call(
        _dice_sums_kernel,
        out_shape=(part_shape, part_shape),
        grid_spec=pltpu.PrefetchScalarGridSpec(
            num_scalar_prefetch=0,
            grid=(blocks,),
            in_specs=[in_spec, in_spec],
            out_specs=[out_spec, out_spec],
        ),
        compiler_params=pltpu.CompilerParams(
            dimension_semantics=("arbitrary",),
            vmem_limit_bytes=VMEM_LIMIT_BYTES,
        ),
        cost_estimate=cost,
    )(xk, tk)

    intersection = jnp.sum(inter_tile)
    total = jnp.sum(total_tile)

    if n_cov < n:
        # Leftover tiles + sub-tile remainder: tiny fused slice+reduce in XLA.
        xr = x[n_cov:].astype(jnp.float32)
        tr = t[n_cov:].astype(jnp.float32)
        intersection = intersection + jnp.sum(xr * tr)
        total = total + jnp.sum(xr) + jnp.sum(tr)

    return _dice_from_sums(intersection, total, smooth)


def dice_loss_ref(inputs, targets, smooth=1.0):
    """Pure-JAX reference mirroring the PyTorch DiceLoss.forward."""
    x = inputs.reshape(-1).astype(jnp.float32)
    t = targets.reshape(-1).astype(jnp.float32)
    intersection = jnp.sum(x * t)
    dice = (2.0 * intersection + smooth) / (jnp.sum(x) + jnp.sum(t) + smooth)
    return 1.0 - dice


if __name__ == "__main__":
    key = jax.random.PRNGKey(0)
    k1, k2, k3, k4 = jax.random.split(key, 4)

    cases = []

    # Spec shape: (B=2, C=4, H=16, W=16) -> 2048 elements, 1024-aligned (free bitcast path).
    shape = (2, 4, 16, 16)
    x1 = jax.random.uniform(k1, shape, dtype=jnp.float32)
    t1 = (jax.random.uniform(k2, shape) > 0.5).astype(jnp.float32)
    cases.append((x1, t1))

    # Unaligned shape -> exercises the sub-tile JAX epilogue.
    shape2 = (2, 4, 16, 17)
    x2 = jax.random.uniform(k3, shape2, dtype=jnp.float32)
    t2 = (jax.random.uniform(k4, shape2) > 0.5).astype(jnp.float32)
    cases.append((x2, t2))

    # Larger aligned shape (128 vreg tiles) -> exercises the in-kernel fori_loop.
    shape3 = (4, 8, 64, 64)
    x3 = jax.random.uniform(k1, shape3, dtype=jnp.float32)
    t3 = (jax.random.uniform(k2, shape3) > 0.5).astype(jnp.float32)
    cases.append((x3, t3))

    for xin, tin in cases:
        # min_kernel_elems lowered so the Pallas kernel runs even at these demo sizes.
        loss = jax.block_until_ready(dice_loss(xin, tin, min_kernel_elems=VREG_ELEMS))
        ref = jax.block_until_ready(dice_loss_ref(xin, tin))
        assert jnp.abs(loss - ref) < 5e-5, (xin.shape, float(loss), float(ref))

    print("KERNEL_OK")
</pallas_src>

<mosaic_0001>
module attributes {stable_mosaic.version = 11 : i64} {
  func.func @_dice_sums_kernel(%arg0: i32, %arg1: memref<2x8x128xf32, #tpu.memory_space<vmem>>, %arg2: memref<2x8x128xf32, #tpu.memory_space<vmem>>, %arg3: memref<8x128xf32, #tpu.memory_space<vmem>>, %arg4: memref<8x128xf32, #tpu.memory_space<vmem>>) attributes {dimension_semantics = [#tpu.dimension_semantics<arbitrary>], iteration_bounds = array<i64: 1>, scalar_prefetch = 0 : i64, scratch_operands = 0 : i64, tpu.core_type = #tpu.core_type<tc>, window_params = [{transform_indices = @transform_0, window_bounds = array<i64: 2, 8, 128>}, {transform_indices = @transform_1, window_bounds = array<i64: 2, 8, 128>}, {pipeline_mode = #tpu.pipeline_mode<synchronous>, transform_indices = @transform_2, window_bounds = array<i64: 8, 128>}, {pipeline_mode = #tpu.pipeline_mode<synchronous>, transform_indices = @transform_3, window_bounds = array<i64: 8, 128>}]} {
    %c0_i32 = arith.constant 0 : i32
    %0 = arith.cmpi eq, %arg0, %c0_i32 : i32
    %1 = arith.extui %0 : i1 to i32
    %c0_i32_0 = arith.constant 0 : i32
    %2 = arith.cmpi ne, %1, %c0_i32_0 : i32
    scf.if %2 {
      %cst_16 = arith.constant 0.000000e+00 : f32
      %18 = vector.broadcast %cst_16 : f32 to vector<8x128xf32>
      %c0_17 = arith.constant 0 : index
      %c0_18 = arith.constant 0 : index
      %19 = vector.load %arg3[%c0_17, %c0_18] : memref<8x128xf32, #tpu.memory_space<vmem>>, vector<8x128xf32>
      tpu.vector_store %arg3[%c0_17, %c0_18], %18 {strides = array<i32>} : memref<8x128xf32, #tpu.memory_space<vmem>>, vector<8x128xf32>,
      %cst_19 = arith.constant 0.000000e+00 : f32
      %20 = vector.broadcast %cst_19 : f32 to vector<8x128xf32>
      %c0_20 = arith.constant 0 : index
      %c0_21 = arith.constant 0 : index
      %21 = vector.load %arg4[%c0_20, %c0_21] : memref<8x128xf32, #tpu.memory_space<vmem>>, vector<8x128xf32>
      tpu.vector_store %arg4[%c0_20, %c0_21], %20 {strides = array<i32>} : memref<8x128xf32, #tpu.memory_space<vmem>>, vector<8x128xf32>,
    } else {
    }
    %cst = arith.constant 0.000000e+00 : f32
    %3 = vector.broadcast %cst : f32 to vector<8x128xf32>
    %c0 = arith.constant 0 : index
    %c0_1 = arith.constant 0 : index
    %c0_2 = arith.constant 0 : index
    %4 = vector.load %arg1[%c0, %c0_1, %c0_2] : memref<2x8x128xf32, #tpu.memory_space<vmem>>, vector<2x8x128xf32>
    %c0_3 = arith.constant 0 : index
    %c0_4 = arith.constant 0 : index
    %c0_5 = arith.constant 0 : index
    %5 = vector.load %arg2[%c0_3, %c0_4, %c0_5] : memref<2x8x128xf32, #tpu.memory_space<vmem>>, vector<2x8x128xf32>
    %6 = arith.mulf %4, %5 : vector<2x8x128xf32>
    %cst_6 = arith.constant dense<0.000000e+00> : vector<8x128xf32>
    %7 = vector.multi_reduction <add>, %6, %cst_6 [0] : vector<2x8x128xf32> to vector<8x128xf32>
    %8 = arith.addf %3, %7 : vector<8x128xf32>
    %9 = arith.addf %4, %5 : vector<2x8x128xf32>
    %cst_7 = arith.constant dense<0.000000e+00> : vector<8x128xf32>
    %10 = vector.multi_reduction <add>, %9, %cst_7 [0] : vector<2x8x128xf32> to vector<8x128xf32>
    %11 = arith.addf %3, %10 : vector<8x128xf32>
    %c0_8 = arith.constant 0 : index
    %c0_9 = arith.constant 0 : index
    %12 = vector.load %arg3[%c0_8, %c0_9] : memref<8x128xf32, #tpu.memory_space<vmem>>, vector<8x128xf32>
    %13 = arith.addf %12, %8 : vector<8x128xf32>
    %c0_10 = arith.constant 0 : index
    %c0_11 = arith.constant 0 : index
    %14 = vector.load %arg3[%c0_10, %c0_11] : memref<8x128xf32, #tpu.memory_space<vmem>>, vector<8x128xf32>
    tpu.vector_store %arg3[%c0_10, %c0_11], %13 {strides = array<i32>} : memref<8x128xf32, #tpu.memory_space<vmem>>, vector<8x128xf32>,
    %c0_12 = arith.constant 0 : index
    %c0_13 = arith.constant 0 : index
    %15 = vector.load %arg4[%c0_12, %c0_13] : memref<8x128xf32, #tpu.memory_space<vmem>>, vector<8x128xf32>
    %16 = arith.addf %15, %11 : vector<8x128xf32>
    %c0_14 = arith.constant 0 : index
    %c0_15 = arith.constant 0 : index
    %17 = vector.load %arg4[%c0_14, %c0_15] : memref<8x128xf32, #tpu.memory_space<vmem>>, vector<8x128xf32>
    tpu.vector_store %arg4[%c0_14, %c0_15], %16 {strides = array<i32>} : memref<8x128xf32, #tpu.memory_space<vmem>>, vector<8x128xf32>,
    return
  }
  func.func @transform_0(%arg0: i32) -> (i32, i32, i32) {
    %c0_i32 = arith.constant 0 : i32
    %c0_i32_0 = arith.constant 0 : i32
    %c0_i32_1 = arith.constant 0 : i32
    return %arg0, %c0_i32, %c0_i32_0 : i32, i32, i32
  }
  func.func @transform_1(%arg0: i32) -> (i32, i32, i32) {
    %c0_i32 = arith.constant 0 : i32
    %c0_i32_0 = arith.constant 0 : i32
    %c0_i32_1 = arith.constant 0 : i32
    return %arg0, %c0_i32, %c0_i32_0 : i32, i32, i32
  }
  func.func @transform_2(%arg0: i32) -> (i32, i32) {
    %c0_i32 = arith.constant 0 : i32
    %c0_i32_0 = arith.constant 0 : i32
    %c0_i32_1 = arith.constant 0 : i32
    return %c0_i32, %c0_i32_0 : i32, i32
  }
  func.func @transform_3(%arg0: i32) -> (i32, i32) {
    %c0_i32 = arith.constant 0 : i32
    %c0_i32_0 = arith.constant 0 : i32
    %c0_i32_1 = arith.constant 0 : i32
    return %c0_i32, %c0_i32_0 : i32, i32
  }
}

</mosaic_0001>

<bundles_post_ra>
// kernel: tpu_custom_call.1
= control target key start
LH: loop header
LB: loop body
LE: loop exit
PB: predicated region body
PF: predicated region fallthrough
CT: control target
= control target key end

     0   :  { %9 = vsyncpa [#allocation3], 0  ;;  %s274_s0 = inlined_call_operand.hbm [shape: f32[2,8,128], index: 0, kind: input, shape index: {}]   ;;  %s275_s1 = inlined_call_operand.hbm [shape: f32[2,8,128], index: 1, kind: input, shape index: {}]   ;;  %s276_s2 = inlined_call_operand.hbm [shape: f32[8,128], index: 2, kind: output, shape index: {0}]   ;;  %s277_s3 = inlined_call_operand.hbm [shape: f32[8,128], index: 3, kind: output, shape index: {1}]  }
   0x1   :  { %10 = vsyncpa [#allocation6], 0 }
   0x2   :  { %11 = vsyncpa [#allocation4], 0 }
   0x3   :  { %12 = vsyncpa [#allocation9], 0  ;;  %s200_s12 = smov [#allocation2]   ;;  %s104_s16 = scalar_lea.hbm %s274_s0, 256 }
   0x4   :  { %s18_s13 = sshll.u32 %s200_s12, 4  ;;  %p105_p0 = scmp.ne.s32.totalorder %s274_s0, %s104_s16  ;;  %s19_s13 = int_to_ptr.vmem [resolvable:$true] %s18_s13 }
   0x5   :  { %p108_p1 = scmp.lt.u32.totalorder %s104_s16, %s274_s0 }
   0x7   :  { %p110_p2 = pnand %p108_p1, %p105_p0 }
   0x9   :  { %113 = shalt.err (!%p110_p2)
}
   0xa   :  { %s114_s21 = scalar_lea.vmem %s19_s13, 256  ;;  %p119_p4 = scmp.lt.s32.totalorder %s19_s13, %s19_s13 }
   0xb   :  { %p115_p3 = scmp.ne.s32.totalorder %s19_s13, %s114_s21  ;;  %p120_p5 = scmp.lt.s32.totalorder %s114_s21, %s114_s21 }
   0xd   :  { %p121_p6 = por %p120_p5, %p119_p4 }
   0xf   :  { %p122_p7 = pnand %p121_p6, %p115_p3 }
  0x11   :  { %125 = shalt.err (!%p122_p7)
}
  0x12   :  { %s201_s22 = smov 128   ;;  %s202_s23 = smov 8  }
  0x13   :  { %24 = dma.hbm_to_vmem [thread:$0]  %s274_s0, 256, %s19_s13, [#allocation3], %s201_s22, %s201_s22, %s202_s23  }
  0x14   :  { %s203_s26 = smov [#allocation5]   ;;  %s126_s30 = scalar_lea.hbm %s275_s1, 256 }
  0x15   :  { %s30_s27 = sshll.u32 %s203_s26, 4  ;;  %p127_p8 = scmp.ne.s32.totalorder %s275_s1, %s126_s30  ;;  %s31_s27 = int_to_ptr.vmem [resolvable:$true] %s30_s27 }
  0x16   :  { %p130_p9 = scmp.lt.u32.totalorder %s126_s30, %s275_s1 }
  0x18   :  { %p132_p10 = pnand %p130_p9, %p127_p8 }
  0x1a   :  { %135 = shalt.err (!%p132_p10)
}
  0x1b   :  { %s136_s8 = scalar_lea.vmem %s31_s27, 256  ;;  %p141_p12 = scmp.lt.s32.totalorder %s31_s27, %s31_s27 }
  0x1c   :  { %p137_p11 = scmp.ne.s32.totalorder %s31_s27, %s136_s8  ;;  %p142_p13 = scmp.lt.s32.totalorder %s136_s8, %s136_s8 }
  0x1e   :  { %p143_p0 = por %p142_p13, %p141_p12 }
  0x20   :  { %p144_p1 = pnand %p143_p0, %p137_p11 }
  0x22   :  { %147 = shalt.err (!%p144_p1)
}
  0x23   :  { %36 = dma.hbm_to_vmem [thread:$0]  %s275_s1, 256, %s31_s27, [#allocation6], %s201_s22, %s201_s22, %s202_s23  }
  0x24   :  { %192 = dma.done.wait [#allocation3], 256  }
  0x25   :  { %193 = vsyncadd [#allocation3], 4294967040 }
  0x26   :  { %194 = dma.done.wait [#allocation6], 256  }
  0x27   :  { %195 = vsyncadd [#allocation6], 4294967040  ;;  %v49_v0 = vld [vmem:[#allocation2] sm:$0xff]  ;;  %v50_v1 = vld [vmem:[#allocation2 + $0x8] sm:$0xff]  ;;  %s204_s10 = smov [#allocation7]   ;;  %s205_s12 = smov [#allocation8]  }
  0x28   :  { %v51_v2 = vld [vmem:[#allocation5] sm:$0xff]  ;;  %v52_v3 = vld [vmem:[#allocation5 + $0x8] sm:$0xff]  ;;  %s73_s11 = sshll.u32 %s204_s10, 4  ;;  %s83_s13 = sshll.u32 %s205_s12, 4  ;;  %s74_s11 = int_to_ptr.vmem [resolvable:$true] %s73_s11  ;;  %s84_s13 = int_to_ptr.vmem [resolvable:$true] %s83_s13 }
  0x29   :  { %v53_v4 = vmul.f32 %v51_v2, %v49_v0  ;;  %v57_v5 = vadd.f32 %v51_v2, %v49_v0  ;;  %v54_v6 = vmul.f32 %v52_v3, %v50_v1  ;;  %v58_v7 = vadd.f32 %v52_v3, %v50_v1  ;;  %s148_s1 = scalar_lea.vmem %s74_s11, 128  ;;  %p153_p3 = scmp.lt.s32.totalorder %s74_s11, %s74_s11 }
  0x2a   :  { %p149_p2 = scmp.ne.s32.totalorder %s74_s11, %s148_s1  ;;  %p154_p4 = scmp.lt.s32.totalorder %s148_s1, %s148_s1 }
  0x2b   :  { %v55_v8 = vadd.f32 %v54_v6, %v53_v4  ;;  %v59_v9 = vadd.f32 %v58_v7, %v57_v5 }
  0x2c   :  { %p155_p5 = por %p154_p4, %p153_p3 }
  0x2d   :  { %63 = vst [vmem:[#allocation7] sm:$0xff] %v55_v8  ;;  %66 = vst [vmem:[#allocation8] sm:$0xff] %v59_v9 }
  0x2e   :  { %p156_p6 = pnand %p155_p5, %p149_p2 }
  0x30   :  { %159 = shalt.err (!%p156_p6)
}
  0x31   :  { %s160_s16 = scalar_lea.hbm %s276_s2, 128 }
  0x32   :  { %p161_p7 = scmp.ne.s32.totalorder %s276_s2, %s160_s16  ;;  %p164_p8 = scmp.lt.u32.totalorder %s160_s16, %s276_s2 }
  0x34   :  { %p166_p9 = pnand %p164_p8, %p161_p7 }
  0x36   :  { %169 = shalt.err (!%p166_p9)
}
  0x37   :  { %76 = dma.vmem_to_hbm [thread:$0]  %s74_s11, 128, %s276_s2, [#allocation4]  }
  0x38   :  { %s170_s23 = scalar_lea.vmem %s84_s13, 128  ;;  %p175_p11 = scmp.lt.s32.totalorder %s84_s13, %s84_s13 }
  0x39   :  { %p171_p10 = scmp.ne.s32.totalorder %s84_s13, %s170_s23  ;;  %p176_p12 = scmp.lt.s32.totalorder %s170_s23, %s170_s23 }
  0x3b   :  { %p177_p13 = por %p176_p12, %p175_p11 }
  0x3d   :  { %p178_p0 = pnand %p177_p13, %p171_p10 }
  0x3f   :  { %181 = shalt.err (!%p178_p0)
}
  0x40   :  { %s182_s26 = scalar_lea.hbm %s277_s3, 128 }
  0x41   :  { %p183_p1 = scmp.ne.s32.totalorder %s277_s3, %s182_s26  ;;  %p186_p2 = scmp.lt.u32.totalorder %s182_s26, %s277_s3 }
  0x43   :  { %p188_p3 = pnand %p186_p2, %p183_p1 }
  0x45   :  { %191 = shalt.err (!%p188_p3)
}
  0x46   :  { %86 = dma.vmem_to_hbm [thread:$0]  %s84_s13, 128, %s277_s3, [#allocation9]  }
  0x47   :  { %196 = dma.done.wait [#allocation4], 128  }
  0x48   :  { %197 = vsyncadd [#allocation4], 4294967168 }
  0x49   :  { %198 = dma.done.wait [#allocation9], 128  }
  0x4a   :  { %199 = vsyncadd [#allocation9], 4294967168 }
  0x4b   :  { %93 = vsyncpa [#allocation3], 1 }
  0x4c   :  { %94 = vsyncpa [#allocation6], 1 }
  0x4d   :  { %95 = vsyncpa [#allocation4], 1 }
  0x4e   :  { %96 = vsyncpa [#allocation9], 1 }

</bundles_post_ra>
